<compile_context>
chip_gen: v5e
topology: v5e:2x2
jax: 0.10.0
libtpu: 0.0.40
codegen_flags: <defaults>
</compile_context>

<pallas_src>
import jax
import jax.numpy as jnp
from jax.experimental import pallas as pl
from jax.experimental.pallas import tpu as pltpu

LANE = 128
BLOCK_BYTES = 4 << 20        # per-buffer block budget (f32: 8192 x 128 rows)
VMEM_LIMIT_BYTES = 32 << 20  # in+out double-buffered 4 MiB blocks = 16 MiB
TINY_FALLBACK_ELEMS = 16384  # below this, fused XLA sin beats a pallas_call


def _sine_kernel(x_ref, o_ref):
    # Elementwise sine on the current VMEM tile. Compute in f32 for parity
    # with the torch.sin reference; the cast is a no-op for f32 inputs.
    x = x_ref[...]
    o_ref[...] = jnp.sin(x.astype(jnp.float32)).astype(o_ref.dtype)


def _round_up(a: int, b: int) -> int:
    return -(-a // b) * b


def _compiler_params():
    return pltpu.CompilerParams(
        dimension_semantics=("parallel",),
        vmem_limit_bytes=VMEM_LIMIT_BYTES,
    )


def _cost(n: int, itemsize: int) -> pl.CostEstimate:
    return pl.CostEstimate(
        flops=0, transcendentals=n, bytes_accessed=2 * n * itemsize)


def sine(x: jnp.ndarray, *, inplace: bool = False,
         min_pallas_elems: int = TINY_FALLBACK_ELEMS) -> jnp.ndarray:
    """Elementwise sin(x) via a Pallas TPU kernel (any shape / float dtype)."""
    orig_shape = x.shape
    dtype = x.dtype
    itemsize = jnp.dtype(dtype).itemsize
    n = int(x.size)

    if n == 0 or n < min_pallas_elems:
        # Tiny tensors: fused XLA sin is faster than a standalone kernel.
        return jnp.sin(x)

    sub = max(8, 32 // itemsize)          # min sublane multiple per dtype
    aliases = {0: 0} if inplace else {}
    flat = x.reshape(-1)                   # bitcast view, no HBM traffic

    if n % LANE == 0:
        # --- 128-aligned fast path: lane-dense (rows, 128) 2-D slab. -------
        rows = n // LANE
        max_rows = max(sub, (BLOCK_BYTES // (LANE * itemsize)) // sub * sub)
        # At least two blocks whenever possible so both v7x TCs get work;
        # ragged last row-block (if any) is masked by Pallas.
        tile_rows = max(sub, min(max_rows, _round_up(pl.cdiv(rows, 2), sub)))
        grid = (pl.cdiv(rows, tile_rows),)
        x2d = flat.reshape(rows, LANE)
        out = pl.pallas_call(
            _sine_kernel,
            out_shape=jax.ShapeDtypeStruct((rows, LANE), dtype),
            grid=grid,
            in_specs=[pl.BlockSpec((tile_rows, LANE), lambda i: (i, 0))],
            out_specs=pl.BlockSpec((tile_rows, LANE), lambda i: (i, 0)),
            compiler_params=_compiler_params(),
            cost_estimate=_cost(n, itemsize),
            input_output_aliases=aliases,
        )(x2d)
        return out.reshape(orig_shape)

    # --- Ragged sizes: zero-copy 1-D kernel; Pallas masks the last block. --
    chunk = sub * LANE                     # keep blocks (8,128)-tile friendly
    n_chunks = pl.cdiv(n, chunk)
    max_chunks = max(1, BLOCK_BYTES // (chunk * itemsize))
    blk_chunks = max(1, min(max_chunks, pl.cdiv(n_chunks, 2)))
    block_elems = blk_chunks * chunk
    grid = (pl.cdiv(n, block_elems),)
    out = pl.pallas_call(
        _sine_kernel,
        out_shape=jax.ShapeDtypeStruct((n,), dtype),
        grid=grid,
        in_specs=[pl.BlockSpec((block_elems,), lambda i: (i,))],
        out_specs=pl.BlockSpec((block_elems,), lambda i: (i,)),
        compiler_params=_compiler_params(),
        cost_estimate=_cost(n, itemsize),
        input_output_aliases=aliases,
    )(flat)
    return out.reshape(orig_shape)


if __name__ == "__main__":
    key = jax.random.PRNGKey(0)
    k0, k1, k2 = jax.random.split(key, 3)

    # Module-consistent small conv activation (N, C, H, W) = (2, 4, 16, 16).
    x = jax.random.normal(k0, (2, 4, 16, 16), dtype=jnp.float32)
    y_fallback = sine(x)                       # tiny-input fused-XLA path
    y_kernel = sine(x, min_pallas_elems=0)     # force the Pallas kernel
    jax.block_until_ready((y_fallback, y_kernel))
    ref = jnp.sin(x)
    assert y_kernel.shape == x.shape and y_kernel.dtype == x.dtype
    assert jnp.allclose(y_fallback, ref, atol=1e-5, rtol=1e-5)
    assert jnp.allclose(y_kernel, ref, atol=1e-5, rtol=1e-5)

    # Larger 128-aligned activation -> lane-dense 2-D path, grid of >=2 blocks.
    x_big = jax.random.normal(k1, (8, 16, 64, 64), dtype=jnp.float32)
    y_big = sine(x_big)
    jax.block_until_ready(y_big)
    assert jnp.allclose(y_big, jnp.sin(x_big), atol=1e-5, rtol=1e-5)

    # Ragged size (flat size not a multiple of 128) -> zero-copy 1-D path.
    x_rag = jax.random.normal(k2, (3, 7, 31, 37), dtype=jnp.float32)
    y_rag = sine(x_rag)
    jax.block_until_ready(y_rag)
    assert jnp.allclose(y_rag, jnp.sin(x_rag), atol=1e-5, rtol=1e-5)

    print("KERNEL_OK")
</pallas_src>

<mosaic_0001>
module attributes {stable_mosaic.version = 11 : i64} {
  func.func @_sine_kernel(%arg0: i32, %arg1: memref<8x128xf32, #tpu.memory_space<vmem>>, %arg2: memref<8x128xf32, #tpu.memory_space<vmem>>) attributes {dimension_semantics = [#tpu.dimension_semantics<parallel>], iteration_bounds = array<i64: 2>, scalar_prefetch = 0 : i64, scratch_operands = 0 : i64, tpu.core_type = #tpu.core_type<tc>, window_params = [{transform_indices = @transform_0, window_bounds = array<i64: 8, 128>}, {transform_indices = @transform_1, window_bounds = array<i64: 8, 128>}]} {
    %c0 = arith.constant 0 : index
    %c0_0 = arith.constant 0 : index
    %0 = vector.load %arg1[%c0, %c0_0] : memref<8x128xf32, #tpu.memory_space<vmem>>, vector<8x128xf32>
    %1 = math.sin %0 : vector<8x128xf32>
    %c0_1 = arith.constant 0 : index
    %c0_2 = arith.constant 0 : index
    %2 = vector.load %arg2[%c0_1, %c0_2] : memref<8x128xf32, #tpu.memory_space<vmem>>, vector<8x128xf32>
    tpu.vector_store %arg2[%c0_1, %c0_2], %1 {strides = array<i32>} : memref<8x128xf32, #tpu.memory_space<vmem>>, vector<8x128xf32>,
    return
  }
  func.func @transform_0(%arg0: i32) -> (i32, i32) {
    %c0_i32 = arith.constant 0 : i32
    %c0_i32_0 = arith.constant 0 : i32
    return %arg0, %c0_i32 : i32, i32
  }
  func.func @transform_1(%arg0: i32) -> (i32, i32) {
    %c0_i32 = arith.constant 0 : i32
    %c0_i32_0 = arith.constant 0 : i32
    return %arg0, %c0_i32 : i32, i32
  }
}

</mosaic_0001>

<bundles_post_ra>
// kernel: tpu_custom_call.1
= control target key start
LH: loop header
LB: loop body
LE: loop exit
PB: predicated region body
PF: predicated region fallthrough
CT: control target
= control target key end

     0   :  { %6 = vsyncpa [#allocation3], 0  ;;  %s737_s0 = inlined_call_operand.hbm [shape: f32[16,128], index: 0, kind: input, shape index: {}]   ;;  %s738_s1 = inlined_call_operand.hbm [shape: f32[16,128], index: 1, kind: output, shape index: {}]  }
   0x1   :  { %8 = vsyncpa [#allocation3 + $0x1], 0 }
   0x2   :  { %9 = vsyncpa [#allocation4], 0 }
   0x3   :  { %11 = vsyncpa [#allocation4 + $0x1], 0  ;;  %s560_s6 = smov 0   ;;  %s562_s7 = smov 0  }
   0x4   :  { %s564_s8 = smov 0   ;;  %s566_s9 = smov 0  }
   0x5 LB: > { %s581_s10 = sadd.s32 4294967295, %s541_s9   ;;  %s377_s11 = sadd.s32 4294967294, %s541_s9   ;;  %s541_s9 = sphi %s566_s9, %s748_s9   ;;  %s537_s8 = sphi %s564_s8, %s747_s8   ;;  %s533_s7 = sphi %s562_s7, %s746_s7   ;;  %s529_s6 = sphi %s560_s6, %s745_s6  }
   0x6   : > { %s585_s12 = sadd.s32 1, %s541_s9   ;;  %s24_s13 = sadd.s32 1, %s537_s8 }
   0x7   : > { %s21_s14 = ssub.s32 %s541_s9, %s585_s12  ;;  %p31_p0 = scmp.ne.s32.totalorder %s537_s8, %s533_s7 }
   0x8   : > { %p22_p1 = scmp.eq.s32.totalorder %s21_s14, 0  ;;  %p32_p2 = scmp.eq.s32.totalorder %s541_s9, 0 }
   0x9   : > { %p37_p3 = scmp.ne.s32.totalorder %s533_s7, %s529_s6  ;;  %p38_p4 = scmp.eq.s32.totalorder %s581_s10, 0 }
   0xa   : > { %s597_s15 = scalar_select %p22_p1, %s537_s8, %s24_s13  }
   0xb   : > { %p599_p5 = por %p32_p2, %p31_p0  ;;  %p603_p6 = por %p38_p4, %p37_p3 }
   0xc   : > { %p61_p7 = scmp.eq.s32.totalorder %s581_s10, 1  ;;  %p67_p8 = scmp.eq.s32.totalorder %s377_s11, 1 }
   0xd   : > { %p404_p10 = scmp.lt.s32.totalorder %s541_s9, 2  ;;  %s87_s20 = sand.u32 1, %s537_s8  }
   0xe   : > { %p610_p11 = por %p61_p7, %p31_p0  ;;  %p614_p12 = por %p67_p8, %p37_p3 }
   0xf   : > { %s381_s21 = sshll.u32 %s541_s9, 3  ;;  %s380_s22 = sshll.u32 %s87_s20, 3 }
  0x10   : > { %s95_s25 = scalar_lea.hbm %s737_s0, %s381_s21  ;;  %s91_s27 = scalar_lea.vmem [#allocation2], %s380_s22 }
  0x11   : > { %s97_s26 = sshll.u32 %s95_s25, 4  ;;  %s99_s28 = sshll.u32 %s91_s27, 4  ;;  %s98_s26 = int_to_ptr.hbm [resolvable:$true] %s97_s26  ;;  %s100_s28 = int_to_ptr.vmem [resolvable:$true] %s99_s28 }
  0x12   : > { %p625_p13 = pnand %p404_p10, %p599_p5  ;;  %p382_p0 = scmp.ge.s32.totalorder %s541_s9, 1 }
  0x13   : > { %p104_p1 = scmp.lt.s32.totalorder %s541_s9, 3  ;;  %s88_s30 = scalar_lea.sflag [#allocation3], %s87_s20 }
  0x14   : > { %s445_s2 = sshra.s32 %s98_s26, 4  ;;  %p449_p3 = pneg %p625_p13  ;;  %s446_s2 = int_to_ptr.hbm [resolvable:$true] %s445_s2 }
  0x15   : > { %s447_s3 = scalar_lea.hbm %s446_s2, 8  ;;  %s452_s11 = scalar_lea.hbm %s737_s0, 16 }
  0x16   : > { %p448_p2 = scmp.ne.s32.totalorder %s446_s2, %s447_s3  ;;  %p453_p5 = scmp.lt.s32.totalorder %s446_s2, %s737_s0 }
  0x17   : > { %p454_p8 = scmp.lt.s32.totalorder %s452_s11, %s447_s3 }
  0x18   : > { %p450_p4 = pnand %p449_p3, %p448_p2 }
  0x19   : > { %p455_p10 = por %p454_p8, %p453_p5 }
  0x1a   : > { %p451_p7 = pneg %p450_p4 }
  0x1c   : > { %p456_p9 = pnand %p455_p10, %p451_p7 }
  0x1e   : > { %459 = shalt.err (!%p456_p9)
}
  0x1f   : > { %399 = dma.hbm_to_vmem [thread:$0]  (!%p625_p13), %s98_s26, 128, %s100_s28, %s88_s30  }
  0x20   : > { %p105_p2 = pnand %p382_p0, %p104_p1 }
  0x21   : > { %s646_s16 = sand.u32 (!%p105_p2), 1, %s533_s7  }
  0x22   : > { %108 = sbr.rel (%p105_p2) target bundleno = 140 (0x8c), region = 24  ;;  %s383_s20 = sshll.u32 (!%p105_p2), %s646_s16, 3 }
  0x23   : > { %s111_s21 = scalar_lea.sflag (!%p105_p2), [#allocation3], %s646_s16  ;;  %s114_s22 = scalar_lea.vmem (!%p105_p2), [#allocation2], %s383_s20 }
  0x27   : > { %520 = dma.done.wait (%p603_p6), %s111_s21, 128  }
  0x28   : > { %522 = vsyncadd (%p603_p6), %s111_s21, 4294967168  ;;  %v656_v0 = vld [vmem:[%s114_s22] sm:$0xff]  ;;  %v543_v12 = vmov 683565275   ;;  %v544_v14 = vmov 2475754826  }
  0x29   : > { %v138_v1 = vand.u32 2139095040, %v656_v0  ;;  %v135_v3 = vand.u32 2147483647, %v656_v0  ;;  %v545_v16 = vmov 2131351028   ;;  %vm137_vm12 = vcmp.lt.s32.totalorder %v656_v0, 0 }
  0x2a   : > { %v546_v18 = vmov 2102212464   ;;  %v547_v20 = vmov 920167782   ;;  %v548_v26 = vmov 1326507024  }
  0x2b   : > { %v139_v2 = vshrl.u32 %v138_v1, 23  ;;  %v142_v6 = vand.u32 8388607, %v135_v3  ;;  %v549_v1 = vmov 0   ;;  %vm136_vm13 = vcmp.le.f32.partialorder %v135_v3, 0.7853982 }
  0x2c   : > { %s389_s17 = sshll.u32 %s581_s10, 3  ;;  %s133_s26 = scalar_lea.vmem [#allocation5], %s383_s20 }
  0x2d   : > { %v385_v4 = vadd.s32 4294967169, %v139_v2  ;;  %v143_v9 = vor.u32 8388608, %v142_v6  ;;  %s302_s25 = scalar_lea.hbm %s738_s1, %s389_s17  ;;  %s304_s27 = sshll.u32 %s133_s26, 4  ;;  %s305_s27 = int_to_ptr.vmem [resolvable:$true] %s304_s27 }
  0x2e   : > { %s306_s28 = sshll.u32 %s302_s25, 4  ;;  %s292_s10 = scalar_lea.sflag [#allocation4], %s646_s16  ;;  %s307_s28 = int_to_ptr.hbm [resolvable:$true] %s306_s28 }
  0x2f   : > { %v145_v5 = vadd.s32 1, %v385_v4  ;;  %v665_v28 = vshll.u32 %v143_v9, 8  ;;  %s489_s29 = sshra.s32 %s307_s28, 4  ;;  %s495_s4 = scalar_lea.hbm %s738_s1, 16  ;;  %s490_s29 = int_to_ptr.hbm [resolvable:$true] %s489_s29 }
  0x30   : > { %s491_s30 = scalar_lea.hbm %s490_s29, 8  ;;  %p496_p0 = scmp.lt.s32.totalorder %s490_s29, %s738_s1 }
  0x31   : > { %vm146_vm0 = vcmp.gt.s32.totalorder %v145_v5, 0  ;;  %v184_v40 = vand.u32 65535, %v665_v28  ;;  %v185_v41 = vshrl.u32 %v665_v28, 16  ;;  %p492_p6 = scmp.ne.s32.totalorder %s490_s29, %s491_s30  ;;  %p497_p1 = scmp.lt.s32.totalorder %s495_s4, %s491_s30 }
  0x32   : > { %v147_v7 = vsel %vm146_vm0, %v145_v5, 0 }
  0x33   : > { %v149_v8 = vand.u32 31, %v147_v7  ;;  %v662_v10 = vshrl.u32 %v147_v7, 5  ;;  %p493_p9 = pnand %p492_p6, %p610_p11  ;;  %p498_p3 = por %p497_p1, %p496_p0 }
  0x35   : > { %v150_v11 = vsub.s32 32, %v149_v8  ;;  %v152_v13 = vshll.u32 %v543_v12, %v149_v8  ;;  %v155_v15 = vshll.u32 %v544_v14, %v149_v8  ;;  %v158_v17 = vshll.u32 %v545_v16, %v149_v8  ;;  %p494_p13 = pneg %p493_p9 }
  0x36   : > { %v161_v19 = vshll.u32 %v546_v18, %v149_v8  ;;  %v164_v21 = vshll.u32 %v547_v20, %v149_v8  ;;  %vm167_vm1 = vcmp.lt.s32.totalorder %v662_v10, 1  ;;  %vm170_vm2 = vcmp.lt.s32.totalorder %v662_v10, 4 }
  0x37   : > { %v153_v22 = vshrl.u32 %v544_v14, %v150_v11  ;;  %v156_v23 = vshrl.u32 %v545_v16, %v150_v11  ;;  %v159_v24 = vshrl.u32 %v546_v18, %v150_v11  ;;  %v162_v25 = vshrl.u32 %v547_v20, %v150_v11  ;;  %p499_p4 = pnand %p498_p3, %p494_p13 }
  0x38   : > { %v165_v27 = vshrl.u32 %v548_v26, %v150_v11  ;;  %vm169_vm3 = vcmp.lt.s32.totalorder %v662_v10, 3  ;;  %vm168_vm4 = vcmp.lt.s32.totalorder %v662_v10, 2  ;;  %v151_v48 = vshrl.u32 %v543_v12, %v150_v11 }
  0x39   : > { %v154_v29 = vor.u32 %v153_v22, %v152_v13  ;;  %v157_v30 = vor.u32 %v156_v23, %v155_v15  ;;  %v160_v31 = vor.u32 %v159_v24, %v158_v17  ;;  %v163_v32 = vor.u32 %v162_v25, %v161_v19 }
  0x3a   : > { %v166_v33 = vor.u32 %v165_v27, %v164_v21 }
  0x3b   : > { %v175_v34 = vsel %vm167_vm1, %v154_v29, %v157_v30  ;;  %v179_v35 = vsel %vm167_vm1, %v157_v30, %v160_v31  ;;  %v176_v36 = vsel %vm170_vm2, %v163_v32, 920167782  ;;  %v171_v61 = vsel %vm167_vm1, %v151_v48, %v154_v29 }
  0x3c   : > { %v180_v37 = vsel %vm170_vm2, %v166_v33, 1326507024  ;;  %v177_v38 = vsel %vm169_vm3, %v160_v31, %v176_v36  ;;  %v172_v63 = vsel %vm170_vm2, %v160_v31, 2102212464  ;;  %vm278_vm1 = vweird.f32 %v656_v0 }
  0x3d   : > { %v181_v39 = vsel %vm169_vm3, %v163_v32, %v180_v37  ;;  %v178_v42 = vsel %vm168_vm4, %v175_v34, %v177_v38  ;;  %v173_v12 = vsel %vm169_vm3, %v157_v30, %v172_v63 }
  0x3e   : > { %v182_v43 = vsel %vm168_vm4, %v179_v35, %v181_v39  ;;  %v208_v46 = vand.u32 65535, %v178_v42  ;;  %v209_v47 = vshrl.u32 %v178_v42, 16  ;;  %v174_v20 = vsel %vm168_vm4, %v171_v61, %v173_v12 }
  0x3f   : > { %v186_v44 = vand.u32 65535, %v182_v43  ;;  %v187_v45 = vshrl.u32 %v182_v43, 16  ;;  %v228_v24 = vmul.u32 %v665_v28, %v174_v20 }
  0x40   : > { %v210_v52 = vmul.u32 %v208_v46, %v184_v40  ;;  %v211_v53 = vmul.u32 %v209_v47, %v184_v40  ;;  %v212_v54 = vmul.u32 %v208_v46, %v185_v41  ;;  %v213_v58 = vmul.u32 %v209_v47, %v185_v41 }
  0x41   : > { %v188_v49 = vmul.u32 %v186_v44, %v184_v40  ;;  %v189_v50 = vmul.u32 %v187_v45, %v184_v40  ;;  %v190_v51 = vmul.u32 %v186_v44, %v185_v41  ;;  %v191_v55 = vmul.u32 %v187_v45, %v185_v41 }
  0x42   : > { %v214_v59 = vshll.u32 %v211_v53, 16  ;;  %v216_v60 = vshll.u32 %v212_v54, 16  ;;  %v215_v9 = vshrl.u32 %v211_v53, 16  ;;  %v217_v16 = vshrl.u32 %v212_v54, 16 }
  0x43   : > { %v192_v56 = vshll.u32 %v189_v50, 16  ;;  %v194_v57 = vshll.u32 %v190_v51, 16  ;;  %v193_v5 = vshrl.u32 %v189_v50, 16  ;;  %v195_v13 = vshrl.u32 %v190_v51, 16 }
  0x44   : > { %vm218_vm6 = vc.u32 %v210_v52, %v214_v59  ;;  %v220_v4 = vadd.s32 %v214_v59, %v210_v52 }
  0x45   : > { %vm196_vm5 = vc.u32 %v188_v49, %v192_v56  ;;  %v198_v62 = vadd.s32 %v192_v56, %v188_v49  ;;  %v219_v7 = vsel %vm218_vm6, 1, %v549_v1 }
  0x46   : > { %v197_v2 = vsel %vm196_vm5, 1, %v549_v1  ;;  %v221_v11 = vadd.s32 %v219_v7, %v213_v58  ;;  %vm222_vm8 = vc.u32 %v220_v4, %v216_v60  ;;  %v224_v19 = vadd.s32 %v220_v4, %v216_v60 }
  0x47   : > { %v199_v6 = vadd.s32 %v197_v2, %v191_v55  ;;  %vm200_vm7 = vc.u32 %v198_v62, %v194_v57  ;;  %v223_v15 = vsel %vm222_vm8, 1, %v549_v1 }
  0x48   : > { %v201_v8 = vsel %vm200_vm7, 1, %v549_v1  ;;  %v225_v17 = vadd.s32 %v223_v15, %v221_v11 }
  0x49   : > { %v203_v14 = vadd.s32 %v201_v8, %v199_v6 }
  0x4a   : > { %v226_v21 = vadd.s32 %v225_v17, %v215_v9 }
  0x4b   : > { %v204_v18 = vadd.s32 %v203_v14, %v193_v5 }
  0x4c   : > { %v227_v23 = vadd.s32 %v226_v21, %v217_v16 }
  0x4d   : > { %v205_v22 = vadd.s32 %v204_v18, %v195_v13 }
  0x4e   : > { %v231_v25 = vadd.s32 1, %v227_v23 }
  0x4f   : > { %vm230_vm9 = vc.u32 %v205_v22, %v224_v19  ;;  %v229_v10 = vadd.s32 %v224_v19, %v205_v22 }
  0x50   : > { %v232_v26 = vsel %vm230_vm9, %v231_v25, %v227_v23 }
  0x51   : > { %v233_v27 = vadd.s32 %v232_v26, %v228_v24 }
  0x53   : > { %v234_v29 = vadd.s32 536870912, %v233_v27 }
  0x55   : > { %v235_v30 = vshrl.u32 %v234_v29, 30 }
  0x57   : > { %v236_v31 = vshll.u32 %v235_v30, 30  ;;  %v259_v48 = vsub.s32 4, %v235_v30 }
  0x59   : > { %v237_v32 = vsub.s32 %v233_v27, %v236_v31  ;;  %v260_v51 = vsel %vm137_vm12, %v259_v48, %v235_v30 }
  0x5a   : > { %v262_v54 = vsel %vm136_vm13, 0, %v260_v51 }
  0x5b   : > { %vm238_vm10 = vcmp.lt.s32.totalorder %v237_v32, 0  ;;  %v239_v33 = vsub.s32 0, %v237_v32  ;;  %v279_v59 = vadd.s32 3, %v262_v54 }
  0x5d   : > { %v240_v34 = vsel %vm238_vm10, %v239_v33, %v237_v32  ;;  %v280_v1 = vand.u32 3, %v279_v59 }
  0x5e   : > { %v241_v35 = vclz %v240_v34 }
  0x5f   : > { %vm285_vm14 = vcmp.eq.s32.totalorder %v280_v1, 2  ;;  %vm282_vm15 = vcmp.eq.s32.totalorder %v280_v1, 0  ;;  %vm281_vm0 = vcmp.lt.s32.totalorder %v280_v1, 2 }
  0x60   : > { %v386_v36 = vadd.s32 4294967294, %v241_v35 }
  0x62   : > { %vm387_vm11 = vcmp.lt.s32.totalorder %v386_v36, 0 }
  0x63   : > { %v244_v37 = vsel %vm387_vm11, 0, %v386_v36 }
  0x64   : > { %v245_v38 = vsub.s32 32, %v244_v37  ;;  %v246_v39 = vshll.u32 %v237_v32, %v244_v37  ;;  %v249_v40 = vsub.s32 4294967266, %v244_v37 }
  0x66   : > { %v247_v28 = vshrl.u32 %v229_v10, %v245_v38  ;;  %v250_v41 = vadd.s32 127, %v249_v40 }
  0x68   : > { %v248_v42 = vor.u32 %v247_v28, %v246_v39  ;;  %v251_v43 = vshll.u32 %v250_v41, 23 }
  0x6a   : > { %v252_v44 = vor.u32 4788187, %v251_v43  ;;  %v255_v45 = vcvt.s32.f32 %v248_v42 }
  0x6c   : > { %v253_v46 = vand.u32 2147483647, %v252_v44 }
  0x6e   : > { %v256_v47 = vmul.f32 %v255_v45, %v253_v46 }
  0x70   : > { %v257_v49 = vxor.u32 2147483648, %v256_v47 }
  0x72   : > { %v258_v50 = vsel %vm137_vm12, %v257_v49, %v256_v47 }
  0x73   : > { %v261_v52 = vsel %vm136_vm13, %v656_v0, %v258_v50 }
  0x74   : > { %v263_v53 = vmul.f32 %v261_v52, %v261_v52 }
  0x76   : > { %v264_v55 = vmul.f32 -0.001358992, %v263_v53  ;;  %v271_v56 = vmul.f32 -0.00019511016, %v263_v53 }
  0x78   : > { %v265_v57 = vadd.f32 0.041655596, %v264_v55  ;;  %v272_v58 = vadd.f32 0.008332121, %v271_v56 }
  0x7a   : > { %v266_v60 = vmul.f32 %v265_v57, %v263_v53  ;;  %v273_v61 = vmul.f32 %v272_v58, %v263_v53 }
  0x7c   : > { %v267_v62 = vadd.f32 -0.4999988, %v266_v60  ;;  %v274_v63 = vadd.f32 -0.16666654, %v273_v61 }
  0x7e   : > { %v268_v3 = vmul.f32 %v267_v62, %v263_v53  ;;  %v275_v2 = vmul.f32 %v274_v63, %v263_v53 }
  0x80   : > { %v269_v4 = vadd.f32 1.0, %v268_v3  ;;  %v276_v5 = vadd.f32 1.0, %v275_v2 }
  0x82   : > { %v277_v6 = vmul.f32 %v276_v5, %v261_v52  ;;  %v286_v7 = vxor.u32 2147483648, %v269_v4 }
  0x84   : > { %v283_v8 = vxor.u32 2147483648, %v277_v6  ;;  %v287_v9 = vsel %vm285_vm14, %v286_v7, %v277_v6 }
  0x86   : > { %v284_v11 = vsel %vm282_vm15, %v269_v4, %v283_v8 }
  0x87   : > { %v288_v12 = vsel %vm281_vm0, %v284_v11, %v287_v9 }
  0x88   : > { %v289_v13 = vsel %vm278_vm1, nan, %v288_v12 }
  0x89   : > { %290 = vst [vmem:[%s133_s26] sm:$0xff] %v289_v13 }
  0x8a   : > { %502 = shalt.err (!%p499_p4)
}
  0x8b   : > { %394 = dma.vmem_to_hbm [thread:$0]  (%p610_p11), %s305_s27, 128, %s307_s28, %s292_s10  }
  0x8c PF: > { %s318_s13 = sand.u32 1, %s529_s6   ;;  %p744_p7 = scmp.ge.s32.totalorder %s541_s9, 2 }
  0x8d   : > { %s319_s14 = scalar_lea.sflag [#allocation4], %s318_s13 }
  0x8e   : > { %p401_p5 = pnand %p744_p7, %p614_p12 }
  0x90   : > { %p402_p8 = pneg %p401_p5 }
  0x92   : > { %524 = dma.done.wait (%p402_p8), %s319_s14, 128  }
  0x93   : > { %526 = vsyncadd (%p402_p8), %s319_s14, 4294967168  ;;  %p14_p10 = scmp.ge.s32.totalorder %s585_s12, 4   ;;  %s745_s6 = smov %s533_s7 }
  0x94   : > { %s746_s7 = smov %s537_s8  ;;  %s747_s8 = smov %s597_s15 }
  0x95   : > { %s748_s9 = smov %s585_s12  ;;  %16 = sbr.rel (!%p14_p10) target bundleno = 5 (0x5), region = 69 }
  0x9a   :  { %325 = vsyncpa [#allocation3], 1 }
  0x9b   :  { %327 = vsyncpa [#allocation3 + $0x1], 1 }
  0x9c   :  { %328 = vsyncpa [#allocation4], 1 }
  0x9d   :  { %330 = vsyncpa [#allocation4 + $0x1], 1 }

</bundles_post_ra>
